<compile_context>
chip_gen: v7x
topology: tpu7x:2x2x1
jax: 0.10.0
libtpu: 0.0.40
codegen_flags: <defaults>
</compile_context>

<pallas_src>
import jax
import jax.numpy as jnp
from jax.experimental import pallas as pl
from jax.experimental.pallas import tpu as pltpu

_INV_SQRT2 = 0.7071067811865476


def _gelu_exact(x):
    # torch.nn.GELU() default (approximate='none'): 0.5*x*(1+erf(x/sqrt(2)))
    return 0.5 * x * (1.0 + jax.lax.erf(x * _INV_SQRT2))


def _pack_weight(weight_oihw, *, W, OW, stride, pad, r, dtype):
    """Banded + row-group-packed weight.

    w_pack[(l, ci, w), (j, ow, co)] = weight[co, ci, l - stride*j, w + pad - stride*ow]
    when both tap indices are valid, else 0.  This folds the KH taps, the
    H-stride decimation, the W zero-padding/stride and the r-row output packing
    into a single (K, Nmm) matrix:  K = L*Cin*W,  Nmm = r*OW*Cout,
    L = stride*(r-1) + KH.
    """
    Cout, Cin, KH, KW = weight_oihw.shape
    L = stride * (r - 1) + KH

    l = jnp.arange(L)
    j = jnp.arange(r)
    kh = l[:, None] - stride * j[None, :]                 # (L, r)
    kh_ok = (kh >= 0) & (kh < KH)
    kh_safe = jnp.clip(kh, 0, KH - 1)

    w_in = jnp.arange(W)
    ow = jnp.arange(OW)
    kw = w_in[:, None] + pad - stride * ow[None, :]       # (W, OW)
    kw_ok = (kw >= 0) & (kw < KW)
    kw_safe = jnp.clip(kw, 0, KW - 1)

    wt = jnp.transpose(weight_oihw, (1, 2, 3, 0)).astype(jnp.float32)   # (Cin,KH,KW,Cout)
    wg = wt[:, kh_safe, :, :]                  # (Cin, L, r, KW, Cout)
    wg = wg[:, :, :, kw_safe, :]               # (Cin, L, r, W, OW, Cout)
    ok = kh_ok[None, :, :, None, None, None] & kw_ok[None, None, None, :, :, None]
    wg = jnp.where(ok, wg, 0.0)
    wg = jnp.transpose(wg, (1, 0, 3, 2, 4, 5))             # (L, Cin, W, r, OW, Cout)
    return wg.reshape(L * Cin * W, r * OW * Cout).astype(dtype)


def _make_kernel(*, Bblk, Cin, H, W, pad, stride, r, OHG, L):
    CW = Cin * W
    Hp = H + 2 * pad
    g = stride * r          # padded-H rows consumed per output row-group

    def kernel(x_ref, w_ref, b_ref, o_ref, xc_ref, rows_ref):
        # x_ref   : (Bblk, Cin, H, W)   NCHW input block
        # w_ref   : (K, Nmm)            banded/packed weight (grid-invariant)
        # b_ref   : (1, Nmm)            bias tiled over (r*OW)
        # o_ref   : (M, Nmm)            lane-dense packed output, M = Bblk*OHG
        # xc_ref  : (Bblk, Hp, CW)      H-padded, channel-interleaved image
        # rows_ref: (M, K)              im2col LHS, K = L*CW on the lane axis

        # ---- stage 1: padded, channel-interleaved image (lane dim = Cin*W) ----
        if pad > 0:
            zhalo = jnp.zeros((pad, CW), jnp.float32)
        for bi in range(Bblk):
            if pad > 0:
                # only the halo rows need zeros; the interior is fully overwritten.
                xc_ref[bi, pl.ds(0, pad), :] = zhalo
                xc_ref[bi, pl.ds(pad + H, pad), :] = zhalo
            for ci in range(Cin):
                xc_ref[bi, pl.ds(pad, H), pl.ds(ci * W, W)] = (
                    x_ref[bi, ci].astype(jnp.float32))

        # ---- stage 2: im2col rows (every element written; no pre-zeroing) ----
        for bi in range(Bblk):
            if g == 1:
                # stride==1, r==1: contiguous (OHG, CW) slab per tap.
                for l in range(L):
                    rows_ref[pl.ds(bi * OHG, OHG), pl.ds(l * CW, CW)] = (
                        xc_ref[bi, pl.ds(l, OHG), :])
            else:
                # stride>1 (and/or r>1): per-row copies absorb the decimation so
                # no strided Ref reads are needed.
                # TODO(synk): if OHG*L gets large, replace with a grouped layout.
                for og in range(OHG):
                    for l in range(L):
                        rows_ref[pl.ds(bi * OHG + og, 1), pl.ds(l * CW, CW)] = (
                            xc_ref[bi, pl.ds(g * og + l, 1), :])

        # ---- stage 3: one MXU matmul + fused bias + exact-erf GELU epilogue ----
        lhs = rows_ref[...].astype(w_ref.dtype)
        acc = jnp.dot(lhs, w_ref[...], preferred_element_type=jnp.float32)
        y = _gelu_exact(acc + b_ref[...])          # full-lane-width epilogue (f32)
        o_ref[...] = y.astype(o_ref.dtype)         # lane-dense store (Nmm >= 128)

    return kernel


def basic_conv(x_nchw, weight_oihw, bias, *, kernel_size, stride,
               mm_dtype=jnp.float32):
    """BasicConv forward: Conv2d(pad=k//2, stride) + bias + GELU. NCHW in/out."""
    Nb, Cin, H, W = x_nchw.shape
    Cout, Cin_w, KH, KW = weight_oihw.shape
    assert Cin == Cin_w and KH == kernel_size and KW == kernel_size
    pad = kernel_size // 2
    OH = (H + 2 * pad - KH) // stride + 1
    OW = (W + 2 * pad - KW) // stride + 1
    OWC = OW * Cout

    # Row-group packing factor: make the matmul/output lane dim >= 128.
    r = 1
    if OWC < 128:
        r = -(-128 // OWC)                  # ceil(128 / OWC)
        r = min(r, OH)
        while r > 1 and OH % r:
            r -= 1
    OHG = OH // r
    L = stride * (r - 1) + KH
    NMM = r * OWC
    CW = Cin * W
    K = L * CW
    Hp = H + 2 * pad

    # Batch blocking: each grid step contributes Bblk*OHG rows to the matmul M.
    Bblk = max(1, min(Nb, 128 // max(1, OHG)))
    while Nb % Bblk:
        Bblk -= 1
    if (Bblk * OHG) % 8 != 0 and Bblk != Nb:
        Bblk = Nb                           # keep output block sublane-aligned
    M = Bblk * OHG
    grid = (Nb // Bblk,)

    w_pack = _pack_weight(weight_oihw, W=W, OW=OW, stride=stride, pad=pad,
                          r=r, dtype=mm_dtype)
    b_pack = jnp.tile(bias.astype(jnp.float32), r * OW).reshape(1, NMM)

    kernel = _make_kernel(Bblk=Bblk, Cin=Cin, H=H, W=W, pad=pad, stride=stride,
                          r=r, OHG=OHG, L=L)

    out_packed = pl.pallas_call(
        kernel,
        out_shape=jax.ShapeDtypeStruct((Nb * OHG, NMM), x_nchw.dtype),
        grid_spec=pltpu.PrefetchScalarGridSpec(
            num_scalar_prefetch=0,
            grid=grid,
            in_specs=[
                pl.BlockSpec((Bblk, Cin, H, W), lambda n: (n, 0, 0, 0)),
                pl.BlockSpec((K, NMM), lambda n: (0, 0)),
                pl.BlockSpec((1, NMM), lambda n: (0, 0)),
            ],
            out_specs=pl.BlockSpec((M, NMM), lambda n: (n, 0)),
            scratch_shapes=[
                pltpu.VMEM((Bblk, Hp, CW), jnp.float32),
                pltpu.VMEM((M, K), jnp.float32),
            ],
        ),
        compiler_params=pltpu.CompilerParams(
            dimension_semantics=("parallel",),
        ),
    )(x_nchw, w_pack, b_pack)

    # (Nb*OHG, r*OW*Cout) -> NCHW: pure wrapper-side layout plumbing.
    out = out_packed.reshape(Nb, OHG, r, OW, Cout)
    out = jnp.transpose(out, (0, 4, 1, 2, 3)).reshape(Nb, Cout, OH, OW)
    return out


def _reference(x_nchw, weight_oihw, bias, *, kernel_size, stride):
    pad = kernel_size // 2
    y = jax.lax.conv_general_dilated(
        x_nchw, weight_oihw,
        window_strides=(stride, stride),
        padding=[(pad, pad), (pad, pad)],
        dimension_numbers=("NCHW", "OIHW", "NCHW"),
    )
    y = y + bias.reshape(1, -1, 1, 1)
    return _gelu_exact(y)


if __name__ == "__main__":
    # BasicConv(in_channel=4, out_channel=8, kernel_size=3, stride=s,
    #           bias=True, norm=False, relu=True, transpose=False)
    def run_case(keys, N, Cin, Cout, H, W, k, s):
        kx, kw, kb = keys
        x = jax.random.normal(kx, (N, Cin, H, W), dtype=jnp.float32)
        fan_in = Cin * k * k
        bound = 1.0 / (fan_in ** 0.5)
        weight = jax.random.uniform(kw, (Cout, Cin, k, k), jnp.float32, -bound, bound)
        bias = jax.random.uniform(kb, (Cout,), jnp.float32, -bound, bound)

        out = basic_conv(x, weight, bias, kernel_size=k, stride=s)
        out = jax.block_until_ready(out)
        ref = _reference(x, weight, bias, kernel_size=k, stride=s)
        assert out.shape == ref.shape, (out.shape, ref.shape)
        assert jnp.allclose(out, ref, atol=1e-4, rtol=1e-4), \
            float(jnp.max(jnp.abs(out - ref)))

    key = jax.random.PRNGKey(0)
    keys = jax.random.split(key, 6)
    run_case(keys[0:3], N=2, Cin=4, Cout=8, H=16, W=16, k=3, s=1)   # stride 1
    run_case(keys[3:6], N=2, Cin=4, Cout=8, H=16, W=16, k=3, s=2)   # stride 2

    print("KERNEL_OK")
</pallas_src>

<mosaic_0001>
module attributes {stable_mosaic.version = 11 : i64} {
  func.func @kernel(%arg0: i32, %arg1: memref<2x4x16x16xf32, #tpu.memory_space<vmem>>, %arg2: memref<192x128xf32, #tpu.memory_space<vmem>>, %arg3: memref<1x128xf32, #tpu.memory_space<vmem>>, %arg4: memref<32x128xf32, #tpu.memory_space<vmem>>, %arg5: memref<2x18x64xf32, #tpu.memory_space<vmem>>, %arg6: memref<32x192xf32, #tpu.memory_space<vmem>>) attributes {dimension_semantics = [#tpu.dimension_semantics<parallel>], iteration_bounds = array<i64: 1>, scalar_prefetch = 0 : i64, scratch_operands = 2 : i64, tpu.core_type = #tpu.core_type<tc>, window_params = [{transform_indices = @transform_0, window_bounds = array<i64: 2, 4, 16, 16>}, {pipeline_mode = #tpu.pipeline_mode<synchronous>, transform_indices = @transform_1, window_bounds = array<i64: 192, 128>}, {pipeline_mode = #tpu.pipeline_mode<synchronous>, transform_indices = @transform_2, window_bounds = array<i64: 1, 128>}, {transform_indices = @transform_3, window_bounds = array<i64: 32, 128>}]} {
    %cst = arith.constant 0.000000e+00 : f32
    %0 = vector.broadcast %cst : f32 to vector<1x64xf32>
    %c0 = arith.constant 0 : index
    %c0_0 = arith.constant 0 : index
    %c0_1 = arith.constant 0 : index
    %1 = vector.load %arg5[%c0, %c0_0, %c0_1] : memref<2x18x64xf32, #tpu.memory_space<vmem>>, vector<1x1x64xf32>
    %2 = vector.shape_cast %1 : vector<1x1x64xf32> to vector<1x64xf32>
    %3 = vector.shape_cast %0 : vector<1x64xf32> to vector<1x1x64xf32>
    tpu.vector_store %arg5[%c0, %c0_0, %c0_1], %3 {strides = array<i32>} : memref<2x18x64xf32, #tpu.memory_space<vmem>>, vector<1x1x64xf32>,
    %c0_2 = arith.constant 0 : index
    %c17 = arith.constant 17 : index
    %c0_3 = arith.constant 0 : index
    %4 = vector.load %arg5[%c0_2, %c17, %c0_3] : memref<2x18x64xf32, #tpu.memory_space<vmem>>, vector<1x1x64xf32>
    %5 = vector.shape_cast %4 : vector<1x1x64xf32> to vector<1x64xf32>
    %6 = vector.shape_cast %0 : vector<1x64xf32> to vector<1x1x64xf32>
    tpu.vector_store %arg5[%c0_2, %c17, %c0_3], %6 {strides = array<i32>} : memref<2x18x64xf32, #tpu.memory_space<vmem>>, vector<1x1x64xf32>,
    %c0_4 = arith.constant 0 : index
    %c0_5 = arith.constant 0 : index
    %c0_6 = arith.constant 0 : index
    %c0_7 = arith.constant 0 : index
    %7 = vector.load %arg1[%c0_4, %c0_5, %c0_6, %c0_7] : memref<2x4x16x16xf32, #tpu.memory_space<vmem>>, vector<1x1x16x16xf32>
    %8 = vector.shape_cast %7 : vector<1x1x16x16xf32> to vector<16x16xf32>
    %c0_8 = arith.constant 0 : index
    %c1 = arith.constant 1 : index
    %c0_9 = arith.constant 0 : index
    %9 = vector.load %arg5[%c0_8, %c1, %c0_9] : memref<2x18x64xf32, #tpu.memory_space<vmem>>, vector<1x16x16xf32>
    %10 = vector.shape_cast %9 : vector<1x16x16xf32> to vector<16x16xf32>
    %11 = vector.shape_cast %8 : vector<16x16xf32> to vector<1x16x16xf32>
    tpu.vector_store %arg5[%c0_8, %c1, %c0_9], %11 {strides = array<i32>} : memref<2x18x64xf32, #tpu.memory_space<vmem>>, vector<1x16x16xf32>,
    %c0_10 = arith.constant 0 : index
    %c1_11 = arith.constant 1 : index
    %c0_12 = arith.constant 0 : index
    %c0_13 = arith.constant 0 : index
    %12 = vector.load %arg1[%c0_10, %c1_11, %c0_12, %c0_13] : memref<2x4x16x16xf32, #tpu.memory_space<vmem>>, vector<1x1x16x16xf32>
    %13 = vector.shape_cast %12 : vector<1x1x16x16xf32> to vector<16x16xf32>
    %c0_14 = arith.constant 0 : index
    %c1_15 = arith.constant 1 : index
    %c16 = arith.constant 16 : index
    %14 = vector.load %arg5[%c0_14, %c1_15, %c16] : memref<2x18x64xf32, #tpu.memory_space<vmem>>, vector<1x16x16xf32>
    %15 = vector.shape_cast %14 : vector<1x16x16xf32> to vector<16x16xf32>
    %16 = vector.shape_cast %13 : vector<16x16xf32> to vector<1x16x16xf32>
    tpu.vector_store %arg5[%c0_14, %c1_15, %c16], %16 {strides = array<i32>} : memref<2x18x64xf32, #tpu.memory_space<vmem>>, vector<1x16x16xf32>,
    %c0_16 = arith.constant 0 : index
    %c2 = arith.constant 2 : index
    %c0_17 = arith.constant 0 : index
    %c0_18 = arith.constant 0 : index
    %17 = vector.load %arg1[%c0_16, %c2, %c0_17, %c0_18] : memref<2x4x16x16xf32, #tpu.memory_space<vmem>>, vector<1x1x16x16xf32>
    %18 = vector.shape_cast %17 : vector<1x1x16x16xf32> to vector<16x16xf32>
    %c0_19 = arith.constant 0 : index
    %c1_20 = arith.constant 1 : index
    %c32 = arith.constant 32 : index
    %19 = vector.load %arg5[%c0_19, %c1_20, %c32] : memref<2x18x64xf32, #tpu.memory_space<vmem>>, vector<1x16x16xf32>
    %20 = vector.shape_cast %19 : vector<1x16x16xf32> to vector<16x16xf32>
    %21 = vector.shape_cast %18 : vector<16x16xf32> to vector<1x16x16xf32>
    tpu.vector_store %arg5[%c0_19, %c1_20, %c32], %21 {strides = array<i32>} : memref<2x18x64xf32, #tpu.memory_space<vmem>>, vector<1x16x16xf32>,
    %c0_21 = arith.constant 0 : index
    %c3 = arith.constant 3 : index
    %c0_22 = arith.constant 0 : index
    %c0_23 = arith.constant 0 : index
    %22 = vector.load %arg1[%c0_21, %c3, %c0_22, %c0_23] : memref<2x4x16x16xf32, #tpu.memory_space<vmem>>, vector<1x1x16x16xf32>
    %23 = vector.shape_cast %22 : vector<1x1x16x16xf32> to vector<16x16xf32>
    %c0_24 = arith.constant 0 : index
    %c1_25 = arith.constant 1 : index
    %c48 = arith.constant 48 : index
    %24 = vector.load %arg5[%c0_24, %c1_25, %c48] : memref<2x18x64xf32, #tpu.memory_space<vmem>>, vector<1x16x16xf32>
    %25 = vector.shape_cast %24 : vector<1x16x16xf32> to vector<16x16xf32>
    %26 = vector.shape_cast %23 : vector<16x16xf32> to vector<1x16x16xf32>
    tpu.vector_store %arg5[%c0_24, %c1_25, %c48], %26 {strides = array<i32>} : memref<2x18x64xf32, #tpu.memory_space<vmem>>, vector<1x16x16xf32>,
    %c1_26 = arith.constant 1 : index
    %c0_27 = arith.constant 0 : index
    %c0_28 = arith.constant 0 : index
    %27 = vector.load %arg5[%c1_26, %c0_27, %c0_28] : memref<2x18x64xf32, #tpu.memory_space<vmem>>, vector<1x1x64xf32>
    %28 = vector.shape_cast %27 : vector<1x1x64xf32> to vector<1x64xf32>
    %29 = vector.shape_cast %0 : vector<1x64xf32> to vector<1x1x64xf32>
    tpu.vector_store %arg5[%c1_26, %c0_27, %c0_28], %29 {strides = array<i32>} : memref<2x18x64xf32, #tpu.memory_space<vmem>>, vector<1x1x64xf32>,
    %c1_29 = arith.constant 1 : index
    %c17_30 = arith.constant 17 : index
    %c0_31 = arith.constant 0 : index
    %30 = vector.load %arg5[%c1_29, %c17_30, %c0_31] : memref<2x18x64xf32, #tpu.memory_space<vmem>>, vector<1x1x64xf32>
    %31 = vector.shape_cast %30 : vector<1x1x64xf32> to vector<1x64xf32>
    %32 = vector.shape_cast %0 : vector<1x64xf32> to vector<1x1x64xf32>
    tpu.vector_store %arg5[%c1_29, %c17_30, %c0_31], %32 {strides = array<i32>} : memref<2x18x64xf32, #tpu.memory_space<vmem>>, vector<1x1x64xf32>,
    %c1_32 = arith.constant 1 : index
    %c0_33 = arith.constant 0 : index
    %c0_34 = arith.constant 0 : index
    %c0_35 = arith.constant 0 : index
    %33 = vector.load %arg1[%c1_32, %c0_33, %c0_34, %c0_35] : memref<2x4x16x16xf32, #tpu.memory_space<vmem>>, vector<1x1x16x16xf32>
    %34 = vector.shape_cast %33 : vector<1x1x16x16xf32> to vector<16x16xf32>
    %c1_36 = arith.constant 1 : index
    %c1_37 = arith.constant 1 : index
    %c0_38 = arith.constant 0 : index
    %35 = vector.load %arg5[%c1_36, %c1_37, %c0_38] : memref<2x18x64xf32, #tpu.memory_space<vmem>>, vector<1x16x16xf32>
    %36 = vector.shape_cast %35 : vector<1x16x16xf32> to vector<16x16xf32>
    %37 = vector.shape_cast %34 : vector<16x16xf32> to vector<1x16x16xf32>
    tpu.vector_store %arg5[%c1_36, %c1_37, %c0_38], %37 {strides = array<i32>} : memref<2x18x64xf32, #tpu.memory_space<vmem>>, vector<1x16x16xf32>,
    %c1_39 = arith.constant 1 : index
    %c1_40 = arith.constant 1 : index
    %c0_41 = arith.constant 0 : index
    %c0_42 = arith.constant 0 : index
    %38 = vector.load %arg1[%c1_39, %c1_40, %c0_41, %c0_42] : memref<2x4x16x16xf32, #tpu.memory_space<vmem>>, vector<1x1x16x16xf32>
    %39 = vector.shape_cast %38 : vector<1x1x16x16xf32> to vector<16x16xf32>
    %c1_43 = arith.constant 1 : index
    %c1_44 = arith.constant 1 : index
    %c16_45 = arith.constant 16 : index
    %40 = vector.load %arg5[%c1_43, %c1_44, %c16_45] : memref<2x18x64xf32, #tpu.memory_space<vmem>>, vector<1x16x16xf32>
    %41 = vector.shape_cast %40 : vector<1x16x16xf32> to vector<16x16xf32>
    %42 = vector.shape_cast %39 : vector<16x16xf32> to vector<1x16x16xf32>
    tpu.vector_store %arg5[%c1_43, %c1_44, %c16_45], %42 {strides = array<i32>} : memref<2x18x64xf32, #tpu.memory_space<vmem>>, vector<1x16x16xf32>,
    %c1_46 = arith.constant 1 : index
    %c2_47 = arith.constant 2 : index
    %c0_48 = arith.constant 0 : index
    %c0_49 = arith.constant 0 : index
    %43 = vector.load %arg1[%c1_46, %c2_47, %c0_48, %c0_49] : memref<2x4x16x16xf32, #tpu.memory_space<vmem>>, vector<1x1x16x16xf32>
    %44 = vector.shape_cast %43 : vector<1x1x16x16xf32> to vector<16x16xf32>
    %c1_50 = arith.constant 1 : index
    %c1_51 = arith.constant 1 : index
    %c32_52 = arith.constant 32 : index
    %45 = vector.load %arg5[%c1_50, %c1_51, %c32_52] : memref<2x18x64xf32, #tpu.memory_space<vmem>>, vector<1x16x16xf32>
    %46 = vector.shape_cast %45 : vector<1x16x16xf32> to vector<16x16xf32>
    %47 = vector.shape_cast %44 : vector<16x16xf32> to vector<1x16x16xf32>
    tpu.vector_store %arg5[%c1_50, %c1_51, %c32_52], %47 {strides = array<i32>} : memref<2x18x64xf32, #tpu.memory_space<vmem>>, vector<1x16x16xf32>,
    %c1_53 = arith.constant 1 : index
    %c3_54 = arith.constant 3 : index
    %c0_55 = arith.constant 0 : index
    %c0_56 = arith.constant 0 : index
    %48 = vector.load %arg1[%c1_53, %c3_54, %c0_55, %c0_56] : memref<2x4x16x16xf32, #tpu.memory_space<vmem>>, vector<1x1x16x16xf32>
    %49 = vector.shape_cast %48 : vector<1x1x16x16xf32> to vector<16x16xf32>
    %c1_57 = arith.constant 1 : index
    %c1_58 = arith.constant 1 : index
    %c48_59 = arith.constant 48 : index
    %50 = vector.load %arg5[%c1_57, %c1_58, %c48_59] : memref<2x18x64xf32, #tpu.memory_space<vmem>>, vector<1x16x16xf32>
    %51 = vector.shape_cast %50 : vector<1x16x16xf32> to vector<16x16xf32>
    %52 = vector.shape_cast %49 : vector<16x16xf32> to vector<1x16x16xf32>
    tpu.vector_store %arg5[%c1_57, %c1_58, %c48_59], %52 {strides = array<i32>} : memref<2x18x64xf32, #tpu.memory_space<vmem>>, vector<1x16x16xf32>,
    %c0_60 = arith.constant 0 : index
    %c0_61 = arith.constant 0 : index
    %c0_62 = arith.constant 0 : index
    %53 = vector.load %arg5[%c0_60, %c0_61, %c0_62] : memref<2x18x64xf32, #tpu.memory_space<vmem>>, vector<1x16x64xf32>
    %54 = vector.shape_cast %53 : vector<1x16x64xf32> to vector<16x64xf32>
    %c0_63 = arith.constant 0 : index
    %c0_64 = arith.constant 0 : index
    %55 = vector.load %arg6[%c0_63, %c0_64] : memref<32x192xf32, #tpu.memory_space<vmem>>, vector<16x64xf32>
    tpu.vector_store %arg6[%c0_63, %c0_64], %54 {strides = array<i32>} : memref<32x192xf32, #tpu.memory_space<vmem>>, vector<16x64xf32>,
    %c0_65 = arith.constant 0 : index
    %c1_66 = arith.constant 1 : index
    %c0_67 = arith.constant 0 : index
    %56 = vector.load %arg5[%c0_65, %c1_66, %c0_67] : memref<2x18x64xf32, #tpu.memory_space<vmem>>, vector<1x16x64xf32>
    %57 = vector.shape_cast %56 : vector<1x16x64xf32> to vector<16x64xf32>
    %c0_68 = arith.constant 0 : index
    %c64 = arith.constant 64 : index
    %58 = vector.load %arg6[%c0_68, %c64] : memref<32x192xf32, #tpu.memory_space<vmem>>, vector<16x64xf32>
    tpu.vector_store %arg6[%c0_68, %c64], %57 {strides = array<i32>} : memref<32x192xf32, #tpu.memory_space<vmem>>, vector<16x64xf32>,
    %c0_69 = arith.constant 0 : index
    %c2_70 = arith.constant 2 : index
    %c0_71 = arith.constant 0 : index
    %59 = vector.load %arg5[%c0_69, %c2_70, %c0_71] : memref<2x18x64xf32, #tpu.memory_space<vmem>>, vector<1x16x64xf32>
    %60 = vector.shape_cast %59 : vector<1x16x64xf32> to vector<16x64xf32>
    %c0_72 = arith.constant 0 : index
    %c128 = arith.constant 128 : index
    %61 = vector.load %arg6[%c0_72, %c128] : memref<32x192xf32, #tpu.memory_space<vmem>>, vector<16x64xf32>
    tpu.vector_store %arg6[%c0_72, %c128], %60 {strides = array<i32>} : memref<32x192xf32, #tpu.memory_space<vmem>>, vector<16x64xf32>,
    %c1_73 = arith.constant 1 : index
    %c0_74 = arith.constant 0 : index
    %c0_75 = arith.constant 0 : index
    %62 = vector.load %arg5[%c1_73, %c0_74, %c0_75] : memref<2x18x64xf32, #tpu.memory_space<vmem>>, vector<1x16x64xf32>
    %63 = vector.shape_cast %62 : vector<1x16x64xf32> to vector<16x64xf32>
    %c16_76 = arith.constant 16 : index
    %c0_77 = arith.constant 0 : index
    %64 = vector.load %arg6[%c16_76, %c0_77] : memref<32x192xf32, #tpu.memory_space<vmem>>, vector<16x64xf32>
    tpu.vector_store %arg6[%c16_76, %c0_77], %63 {strides = array<i32>} : memref<32x192xf32, #tpu.memory_space<vmem>>, vector<16x64xf32>,
    %c1_78 = arith.constant 1 : index
    %c1_79 = arith.constant 1 : index
    %c0_80 = arith.constant 0 : index
    %65 = vector.load %arg5[%c1_78, %c1_79, %c0_80] : memref<2x18x64xf32, #tpu.memory_space<vmem>>, vector<1x16x64xf32>
    %66 = vector.shape_cast %65 : vector<1x16x64xf32> to vector<16x64xf32>
    %c16_81 = arith.constant 16 : index
    %c64_82 = arith.constant 64 : index
    %67 = vector.load %arg6[%c16_81, %c64_82] : memref<32x192xf32, #tpu.memory_space<vmem>>, vector<16x64xf32>
    tpu.vector_store %arg6[%c16_81, %c64_82], %66 {strides = array<i32>} : memref<32x192xf32, #tpu.memory_space<vmem>>, vector<16x64xf32>,
    %c1_83 = arith.constant 1 : index
    %c2_84 = arith.constant 2 : index
    %c0_85 = arith.constant 0 : index
    %68 = vector.load %arg5[%c1_83, %c2_84, %c0_85] : memref<2x18x64xf32, #tpu.memory_space<vmem>>, vector<1x16x64xf32>
    %69 = vector.shape_cast %68 : vector<1x16x64xf32> to vector<16x64xf32>
    %c16_86 = arith.constant 16 : index
    %c128_87 = arith.constant 128 : index
    %70 = vector.load %arg6[%c16_86, %c128_87] : memref<32x192xf32, #tpu.memory_space<vmem>>, vector<16x64xf32>
    tpu.vector_store %arg6[%c16_86, %c128_87], %69 {strides = array<i32>} : memref<32x192xf32, #tpu.memory_space<vmem>>, vector<16x64xf32>,
    %c0_88 = arith.constant 0 : index
    %c0_89 = arith.constant 0 : index
    %71 = vector.load %arg6[%c0_88, %c0_89] : memref<32x192xf32, #tpu.memory_space<vmem>>, vector<32x192xf32>
    %c0_90 = arith.constant 0 : index
    %c0_91 = arith.constant 0 : index
    %72 = vector.load %arg2[%c0_90, %c0_91] : memref<192x128xf32, #tpu.memory_space<vmem>>, vector<192x128xf32>
    %cst_92 = arith.constant dense<0.000000e+00> : vector<32x128xf32>
    %73 = tpu.matmul %71, %72, %cst_92 {dimension_numbers = #tpu.dot_dimension_numbers<[1], [0], [0], [1], [0, 0, 1, 1], [], []>} : vector<32x192xf32>, vector<192x128xf32>, vector<32x128xf32> -> vector<32x128xf32>
    %c0_93 = arith.constant 0 : index
    %c0_94 = arith.constant 0 : index
    %74 = vector.load %arg3[%c0_93, %c0_94] : memref<1x128xf32, #tpu.memory_space<vmem>>, vector<1x128xf32>
    %75 = vector.broadcast %74 : vector<1x128xf32> to vector<32x128xf32>
    %76 = arith.addf %73, %75 : vector<32x128xf32>
    %cst_95 = arith.constant 5.000000e-01 : f32
    %77 = vector.broadcast %cst_95 : f32 to vector<32x128xf32>
    %78 = arith.mulf %77, %76 : vector<32x128xf32>
    %cst_96 = arith.constant 0.707106769 : f32
    %79 = vector.broadcast %cst_96 : f32 to vector<32x128xf32>
    %80 = arith.mulf %76, %79 : vector<32x128xf32>
    %81 = math.erf %80 : vector<32x128xf32>
    %cst_97 = arith.constant 1.000000e+00 : f32
    %82 = vector.broadcast %cst_97 : f32 to vector<32x128xf32>
    %83 = arith.addf %82, %81 : vector<32x128xf32>
    %84 = arith.mulf %78, %83 : vector<32x128xf32>
    %c0_98 = arith.constant 0 : index
    %c0_99 = arith.constant 0 : index
    %85 = vector.load %arg4[%c0_98, %c0_99] : memref<32x128xf32, #tpu.memory_space<vmem>>, vector<32x128xf32>
    tpu.vector_store %arg4[%c0_98, %c0_99], %84 {strides = array<i32>} : memref<32x128xf32, #tpu.memory_space<vmem>>, vector<32x128xf32>,
    return
  }
  func.func @transform_0(%arg0: i32) -> (i32, i32, i32, i32) {
    %c0_i32 = arith.constant 0 : i32
    %c0_i32_0 = arith.constant 0 : i32
    %c0_i32_1 = arith.constant 0 : i32
    %c0_i32_2 = arith.constant 0 : i32
    return %arg0, %c0_i32, %c0_i32_0, %c0_i32_1 : i32, i32, i32, i32
  }
  func.func @transform_1(%arg0: i32) -> (i32, i32) {
    %c0_i32 = arith.constant 0 : i32
    %c0_i32_0 = arith.constant 0 : i32
    %c0_i32_1 = arith.constant 0 : i32
    return %c0_i32, %c0_i32_0 : i32, i32
  }
  func.func @transform_2(%arg0: i32) -> (i32, i32) {
    %c0_i32 = arith.constant 0 : i32
    %c0_i32_0 = arith.constant 0 : i32
    %c0_i32_1 = arith.constant 0 : i32
    return %c0_i32, %c0_i32_0 : i32, i32
  }
  func.func @transform_3(%arg0: i32) -> (i32, i32) {
    %c0_i32 = arith.constant 0 : i32
    %c0_i32_0 = arith.constant 0 : i32
    return %arg0, %c0_i32 : i32, i32
  }
}

</mosaic_0001>

<bundles_post_ra>
// kernel: tpu_custom_call.1
= control target key start
LH: loop header
LB: loop body
LE: loop exit
PB: predicated region body
PF: predicated region fallthrough
CT: control target
= control target key end

     0   :  { %8 = vsyncpa [#allocation5], 0  ;;  %s647_s0 = inlined_call_operand.hbm [shape: f32[2,4,16,16], index: 0, kind: input, shape index: {}]   ;;  %s648_s1 = inlined_call_operand.hbm [shape: f32[192,128], index: 1, kind: input, shape index: {}]   ;;  %s649_s2 = inlined_call_operand.vmem [shape: f32[1,128], index: 2, kind: input, shape index: {}]   ;;  %s650_s3 = inlined_call_operand.hbm [shape: f32[32,128], index: 3, kind: output, shape index: {}]  }
   0x1   :  { %9 = vsyncpa [#allocation8], 0 }
   0x2   :  { %10 = vsyncpa [#allocation6], 0  ;;  %s516_s12 = smov [#allocation4]   ;;  %s444_s16 = scalar_lea.hbm %s647_s0, 2048 }
   0x3   :  { %s16_s13 = sshll.u32 %s516_s12, 4  ;;  %p445_p0 = scmp.ne.s32.totalorder %s647_s0, %s444_s16  ;;  %s17_s13 = int_to_ptr.vmem [resolvable:$true] %s16_s13 }
   0x4   :  { %p448_p1 = scmp.lt.u32.totalorder %s444_s16, %s647_s0 }
   0x6   :  { %p450_p2 = pnand %p448_p1, %p445_p0 }
   0x8   :  { %453 = shalt.err (!%p450_p2)
}
   0x9   :  { %s454_s21 = scalar_lea.vmem %s17_s13, 2048  ;;  %p459_p4 = scmp.lt.s32.totalorder %s17_s13, %s17_s13 }
   0xa   :  { %p455_p3 = scmp.ne.s32.totalorder %s17_s13, %s454_s21  ;;  %p460_p5 = scmp.lt.s32.totalorder %s454_s21, %s454_s21 }
   0xc   :  { %p461_p6 = por %p460_p5, %p459_p4 }
   0xe   :  { %p462_p7 = pnand %p461_p6, %p455_p3 }
  0x10   :  { %465 = shalt.err (!%p462_p7)
}
  0x11   :  { %s517_s22 = smov 128   ;;  %s518_s23 = smov 8  }
  0x12   :  { %22 = dma.hbm_to_vmem [thread:$0]  %s647_s0, 2048, %s17_s13, [#allocation5], %s517_s22, %s517_s22, %s518_s23  }
  0x13   :  { %s519_s26 = smov [#allocation7]   ;;  %s466_s30 = scalar_lea.hbm %s648_s1, 3072 }
  0x14   :  { %s28_s27 = sshll.u32 %s519_s26, 4  ;;  %p467_p8 = scmp.ne.s32.totalorder %s648_s1, %s466_s30  ;;  %s29_s27 = int_to_ptr.vmem [resolvable:$true] %s28_s27 }
  0x15   :  { %p470_p9 = scmp.lt.u32.totalorder %s466_s30, %s648_s1 }
  0x17   :  { %p472_p10 = pnand %p470_p9, %p467_p8 }
  0x19   :  { %475 = shalt.err (!%p472_p10)
}
  0x1a   :  { %s476_s8 = scalar_lea.vmem %s29_s27, 3072  ;;  %p481_p12 = scmp.lt.s32.totalorder %s29_s27, %s29_s27 }
  0x1b   :  { %p477_p11 = scmp.ne.s32.totalorder %s29_s27, %s476_s8  ;;  %p482_p13 = scmp.lt.s32.totalorder %s476_s8, %s476_s8 }
  0x1d   :  { %p483_p0 = por %p482_p13, %p481_p12 }
  0x1f   :  { %p484_p1 = pnand %p483_p0, %p477_p11 }
  0x21   :  { %487 = shalt.err (!%p484_p1)
}
  0x22   :  { %34 = dma.hbm_to_vmem [thread:$0]  %s648_s1, 3072, %s29_s27, [#allocation8], %s517_s22, %s517_s22, %s518_s23  }
  0x23   :  { %510 = dma.done.wait [#allocation5], 2048  }
  0x24   :  { %511 = vsyncadd [#allocation5], 4294965248 }
  0x25   :  { %512 = dma.done.wait [#allocation8], 3072  }
  0x26   :  { %513 = vsyncadd [#allocation8], 4294964224  ;;  %vm43_vm0 = vcmask 516096   ;;  %v520_v0 = vmov 0.0   ;;  %v66_v1 = vld [vmem:[#allocation4 + $0x20] sm:$0xff]  ;;  %v52_v2 = vld [vmem:[#allocation4 + $0x10] sm:$0xff] }
  0x27   :  { %95 = vst.msk [vmem:[#allocation2 + $0x29] sm:$0x1] %vm43_vm0, %v520_v0  ;;  %44 = vst.msk [vmem:[#allocation2] sm:$0x1] %vm43_vm0, %v520_v0  ;;  %s521_s10 = smov 32   ;;  %s522_s11 = smov 16  }
  0x28   :  { %45 = vst.msk [vmem:[#allocation2 + $0x11] sm:$0x1] %vm43_vm0, %v520_v0  ;;  %94 = vst.msk [vmem:[#allocation2 + $0x18] sm:$0x1] %vm43_vm0, %v520_v0  ;;  %70 = vrot.lane.b32.xlu1 %v66_v1, %s521_s10  ;;  %56 = vrot.lane.b32.xlu0 %v52_v2, %s522_s11  ;;  %v115_v3 = vld [vmem:[#allocation4 + $0x60] sm:$0xff]  ;;  %v102_v4 = vld [vmem:[#allocation4 + $0x50] sm:$0xff] }
  0x29   :  { %vm48_vm1 = vcmask 130048   ;;  %v46_v5 = vld [vmem:[#allocation4] sm:$0xff]  ;;  %v98_v7 = vld [vmem:[#allocation4 + $0x48] sm:$0xff]  ;;  %v128_v9 = vld [vmem:[#allocation4 + $0x70] sm:$0xff]  ;;  %s523_s1 = smov 48   ;;  %v524_v20 = vmov 0.0|0.0  }
  0x2a   :  { %v97_v6 = vld [vmem:[#allocation4 + $0x40] sm:$0xff]  ;;  %49 = vst.msk [vmem:[#allocation2 + $0x1] sm:$0xff] %vm48_vm1, %v46_v5  ;;  %100 = vst.msk [vmem:[#allocation2 + $0x21] sm:$0xff] %vm48_vm1, %v98_v7  ;;  %v47_v8 = vld [vmem:[#allocation4 + $0x8] sm:$0xff]  ;;  %365 = vmatprep.subr.bf16.mxu0 %v524_v20  ;;  %401 = vmatprep.subr.bf16.mxu1 %v524_v20  ;;  %vm62_vm2 = vcmask 261248   ;;  %vm76_vm3 = vcmask 392448  }
  0x2b   :  { %99 = vst.msk [vmem:[#allocation2 + $0x19] sm:$0xff] %vm48_vm1, %v97_v6  ;;  %v80_v10 = vld [vmem:[#allocation4 + $0x30] sm:$0xff]  ;;  %50 = vst.msk [vmem:[#allocation2 + $0x9] sm:$0xff] %vm48_vm1, %v47_v8  ;;  %v103_v11 = vld [vmem:[#allocation4 + $0x58] sm:$0xff]  ;;  %vm90_vm4 = vcmask 523648   ;;  %vm142_vm5 = vcmask 523264  }
  0x2c   :  { %119 = vrot.lane.b32.xlu1 %v115_v3, %s521_s10  ;;  %106 = vrot.lane.b32.xlu0 %v102_v4, %s522_s11  ;;  %v53_v12 = vld [vmem:[#allocation4 + $0x18] sm:$0xff]  ;;  %v116_v13 = vld [vmem:[#allocation4 + $0x68] sm:$0xff]  ;;  %v190_v17 = vld [vmem:[#allocation7] sm:$0xff]  ;;  %s525_s12 = smov 64   ;;  %vm155_vm6 = vcmask 1048064  }
  0x2d   :  { %v67_v14 = vld [vmem:[#allocation4 + $0x28] sm:$0xff]  ;;  %v129_v15 = vld [vmem:[#allocation4 + $0x78] sm:$0xff]  ;;  %v192_v19 = vld [vmem:[#allocation7 + $0x10] sm:$0xff] }
  0x2e   :  { %v81_v16 = vld [vmem:[#allocation4 + $0x38] sm:$0xff]  ;;  %v191_v18 = vld [vmem:[#allocation7 + $0x8] sm:$0xff]  ;;  %v194_v24 = vld [vmem:[#allocation7 + $0x20] sm:$0xff] }
  0x2f   :  { %v366_v21 = vpack.c.bf16 %v191_v18, %v190_v17  ;;  %v193_v22 = vld [vmem:[#allocation7 + $0x18] sm:$0xff]  ;;  %v195_v25 = vld [vmem:[#allocation7 + $0x28] sm:$0xff]  ;;  %v196_v27 = vld [vmem:[#allocation7 + $0x30] sm:$0xff] }
  0x30   :  { %132 = vrot.lane.b32.xlu1 %v128_v9, %s523_s1  ;;  %84 = vrot.lane.b32.xlu0 %v80_v10, %s523_s1  ;;  %v369_v23 = vpack.c.bf16 %v193_v22, %v192_v19  ;;  %v372_v26 = vpack.c.bf16 %v195_v25, %v194_v24  ;;  %v197_v28 = vld [vmem:[#allocation7 + $0x38] sm:$0xff]  ;;  %v198_v30 = vld [vmem:[#allocation7 + $0x40] sm:$0xff]  ;;  %v199_v31 = vld [vmem:[#allocation7 + $0x48] sm:$0xff] }
  0x31   :  { %367 = vmatpush1.bf16.msra.mxu0 %v366_v21  ;;  %413 = vmatpush1.bf16.msra.mxu1 %v366_v21  ;;  %v375_v29 = vpack.c.bf16 %v197_v28, %v196_v27  ;;  %v378_v32 = vpack.c.bf16 %v199_v31, %v198_v30  ;;  %v200_v33 = vld [vmem:[#allocation7 + $0x50] sm:$0xff]  ;;  %v201_v34 = vld [vmem:[#allocation7 + $0x58] sm:$0xff]  ;;  %v202_v36 = vld [vmem:[#allocation7 + $0x60] sm:$0xff] }
  0x32   :  { %368 = vmatprep.subr.bf16.mxu0 %v524_v20  ;;  %402 = vmatprep.subr.bf16.mxu1 %v524_v20  ;;  %v381_v35 = vpack.c.bf16 %v201_v34, %v200_v33  ;;  %v203_v37 = vld [vmem:[#allocation7 + $0x68] sm:$0xff]  ;;  %v204_v39 = vld [vmem:[#allocation7 + $0x70] sm:$0xff]  ;;  %v205_v40 = vld [vmem:[#allocation7 + $0x78] sm:$0xff] }
  0x33   :  { %v384_v38 = vpack.c.bf16 %v203_v37, %v202_v36  ;;  %v387_v41 = vpack.c.bf16 %v205_v40, %v204_v39  ;;  %v206_v42 = vld [vmem:[#allocation7 + $0x80] sm:$0xff]  ;;  %v207_v43 = vld [vmem:[#allocation7 + $0x88] sm:$0xff]  ;;  %v208_v45 = vld [vmem:[#allocation7 + $0x90] sm:$0xff] }
  0x34   :  { %108 = vrot.lane.b32.xlu1 %v103_v11, %s522_s11  ;;  %58 = vrot.lane.b32.xlu0 %v53_v12, %s522_s11  ;;  %v390_v44 = vpack.c.bf16 %v207_v43, %v206_v42  ;;  %v209_v46 = vld [vmem:[#allocation7 + $0x98] sm:$0xff]  ;;  %v210_v50 = vld [vmem:[#allocation7 + $0xa0] sm:$0xff]  ;;  %v211_v51 = vld [vmem:[#allocation7 + $0xa8] sm:$0xff] }
  0x35   :  { %370 = vmatpush1.bf16.msra.mxu0 %v369_v23  ;;  %414 = vmatpush1.bf16.msra.mxu1 %v369_v23  ;;  %v393_v47 = vpack.c.bf16 %v209_v46, %v208_v45  ;;  %v396_v54 = vpack.c.bf16 %v211_v51, %v210_v50  ;;  %v212_v55 = vld [vmem:[#allocation7 + $0xb0] sm:$0xff]  ;;  %v213_v56 = vld [vmem:[#allocation7 + $0xb8] sm:$0xff] }
  0x36   :  { %371 = vmatprep.subr.bf16.mxu0 %v524_v20  ;;  %403 = vmatprep.subr.bf16.mxu1 %v524_v20  ;;  %v399_v57 = vpack.c.bf16 %v213_v56, %v212_v55 }
  0x38   :  { %121 = vrot.lane.b32.xlu1 %v116_v13, %s521_s10  ;;  %72 = vrot.lane.b32.xlu0 %v67_v14, %s521_s10 }
  0x39   :  { %373 = vmatpush1.bf16.msra.mxu0 %v372_v26  ;;  %415 = vmatpush1.bf16.msra.mxu1 %v372_v26  ;;  %v360_v26 = vld [vmem:[%s649_s2] ss:$0 sm:$0xff]  ;;  %s526_s2 = smov [#allocation9]  }
  0x3a   :  { %374 = vmatprep.subr.bf16.mxu0 %v524_v20  ;;  %404 = vmatprep.subr.bf16.mxu1 %v524_v20  ;;  %s347_s15 = sshll.u32 %s526_s2, 4  ;;  %s348_s15 = int_to_ptr.vmem [resolvable:$true] %s347_s15 }
  0x3b   :  { %s488_s16 = scalar_lea.vmem %s348_s15, 512  ;;  %p493_p3 = scmp.lt.s32.totalorder %s348_s15, %s348_s15 }
  0x3c   :  { %134 = vrot.lane.b32.xlu1 %v129_v15, %s523_s1  ;;  %86 = vrot.lane.b32.xlu0 %v81_v16, %s523_s1  ;;  %p489_p2 = scmp.ne.s32.totalorder %s348_s15, %s488_s16  ;;  %p494_p4 = scmp.lt.s32.totalorder %s488_s16, %s488_s16 }
  0x3d   :  { %376 = vmatpush1.bf16.msra.mxu0 %v375_v29  ;;  %416 = vmatpush1.bf16.msra.mxu1 %v375_v29 }
  0x3e   :  { %377 = vmatprep.subr.bf16.mxu0 %v524_v20  ;;  %405 = vmatprep.subr.bf16.mxu1 %v524_v20  ;;  %p495_p5 = por %p494_p4, %p493_p3 }
  0x40   :  { %p496_p6 = pnand %p495_p5, %p489_p2 }
  0x41   :  { %379 = vmatpush1.bf16.msra.mxu0 %v378_v32  ;;  %417 = vmatpush1.bf16.msra.mxu1 %v378_v32 }
  0x42   :  { %380 = vmatprep.subr.bf16.mxu0 %v524_v20  ;;  %406 = vmatprep.subr.bf16.mxu1 %v524_v20 }
  0x45   :  { %382 = vmatpush1.bf16.msra.mxu0 %v381_v35  ;;  %418 = vmatpush1.bf16.msra.mxu1 %v381_v35 }
  0x46   :  { %383 = vmatprep.subr.bf16.mxu0 %v524_v20  ;;  %407 = vmatprep.subr.bf16.mxu1 %v524_v20 }
  0x49   :  { %385 = vmatpush1.bf16.msra.mxu0 %v384_v38  ;;  %419 = vmatpush1.bf16.msra.mxu1 %v384_v38 }
  0x4a   :  { %386 = vmatprep.subr.bf16.mxu0 %v524_v20  ;;  %408 = vmatprep.subr.bf16.mxu1 %v524_v20 }
  0x4d   :  { %388 = vmatpush1.bf16.msra.mxu0 %v387_v41  ;;  %420 = vmatpush1.bf16.msra.mxu1 %v387_v41 }
  0x4e   :  { %389 = vmatprep.subr.bf16.mxu0 %v524_v20  ;;  %409 = vmatprep.subr.bf16.mxu1 %v524_v20 }
  0x51   :  { %391 = vmatpush1.bf16.msra.mxu0 %v390_v44  ;;  %421 = vmatpush1.bf16.msra.mxu1 %v390_v44 }
  0x52   :  { %392 = vmatprep.subr.bf16.mxu0 %v524_v20  ;;  %410 = vmatprep.subr.bf16.mxu1 %v524_v20 }
  0x55   :  { %394 = vmatpush1.bf16.msra.mxu0 %v393_v47  ;;  %422 = vmatpush1.bf16.msra.mxu1 %v393_v47 }
  0x56   :  { %395 = vmatprep.subr.bf16.mxu0 %v524_v20  ;;  %411 = vmatprep.subr.bf16.mxu1 %v524_v20 }
  0x59   :  { %397 = vmatpush1.bf16.msra.mxu0 %v396_v54  ;;  %423 = vmatpush1.bf16.msra.mxu1 %v396_v54 }
  0x5a   :  { %398 = vmatprep.subr.bf16.mxu0 %v524_v20  ;;  %412 = vmatprep.subr.bf16.mxu1 %v524_v20 }
  0x5d   :  { %400 = vmatpush1.bf16.msra.mxu0 %v399_v57  ;;  %424 = vmatpush1.bf16.msra.mxu1 %v399_v57 }
  0x9a   :  { %v71_v48 = vpop.permute.xlu1 %70  ;;  %v57_v49 = vpop.permute.xlu0 %56 }
  0x9b   :  { %63 = vst.msk [vmem:[#allocation2 + $0x1] sm:$0xff] %vm62_vm2, %v57_v49 }
  0x9c   :  { %77 = vst.msk [vmem:[#allocation2 + $0x1] sm:$0xff] %vm76_vm3, %v71_v48 }
  0x9e   :  { %v120_v52 = vpop.permute.xlu1 %119  ;;  %v107_v53 = vpop.permute.xlu0 %106 }
  0x9f   :  { %112 = vst.msk [vmem:[#allocation2 + $0x19] sm:$0xff] %vm62_vm2, %v107_v53 }
  0xa0   :  { %125 = vst.msk [vmem:[#allocation2 + $0x19] sm:$0xff] %vm76_vm3, %v120_v52 }
  0xa2   :  { %v133_v58 = vpop.permute.xlu1 %132  ;;  %v85_v59 = vpop.permute.xlu0 %84 }
  0xa3   :  { %138 = vst.msk [vmem:[#allocation2 + $0x19] sm:$0xff] %vm90_vm4, %v133_v58  ;;  %91 = vst.msk [vmem:[#allocation2 + $0x1] sm:$0xff] %vm90_vm4, %v85_v59 }
  0xa6   :  { %v109_v60 = vpop.permute.xlu1 %108  ;;  %v59_v61 = vpop.permute.xlu0 %58 }
  0xa7   :  { %113 = vst.msk [vmem:[#allocation2 + $0x21] sm:$0xff] %vm62_vm2, %v109_v60  ;;  %64 = vst.msk [vmem:[#allocation2 + $0x9] sm:$0xff] %vm62_vm2, %v59_v61 }
  0xaa   :  { %v122_v62 = vpop.permute.xlu1 %121  ;;  %v73_v63 = vpop.permute.xlu0 %72  ;;  %v166_v0 = vld [vmem:[#allocation2 + $0x19] sm:$0xff]  ;;  %v145_v1 = vld [vmem:[#allocation2 + $0x1] sm:$0xff] }
  0xab   :  { %v162_v2 = vld [vmem:[#allocation2 + $0x18] sm:$0xff]  ;;  %126 = vst.msk [vmem:[#allocation2 + $0x21] sm:$0xff] %vm76_vm3, %v122_v62  ;;  %78 = vst.msk [vmem:[#allocation2 + $0x9] sm:$0xff] %vm76_vm3, %v73_v63  ;;  %170 = vrot.lane.b32.xlu1 %v166_v0, %s525_s12  ;;  %149 = vrot.lane.b32.xlu0 %v145_v1, %s525_s12  ;;  %v140_v3 = vld [vmem:[#allocation2] sm:$0xff] }
  0xac   :  { %164 = vst.msk [vmem:[#allocation3 + $0x20] sm:$0xff] %vm142_vm5, %v162_v2  ;;  %143 = vst.msk [vmem:[#allocation3] sm:$0xff] %vm142_vm5, %v140_v3 }
  0xae   :  { %v135_v4 = vpop.permute.xlu1 %134  ;;  %v87_v5 = vpop.permute.xlu0 %86 }
  0xaf   :  { %139 = vst.msk [vmem:[#allocation2 + $0x21] sm:$0xff] %vm90_vm4, %v135_v4  ;;  %92 = vst.msk [vmem:[#allocation2 + $0x9] sm:$0xff] %vm90_vm4, %v87_v5 }
  0xb6   :  { %v179_v6 = vld [vmem:[#allocation2 + $0x22] sm:$0xff]  ;;  %v159_v7 = vld [vmem:[#allocation2 + $0xa] sm:$0xff]  ;;  %v178_v11 = vld [vmem:[#allocation2 + $0x1a] sm:$0xff] }
  0xb7   :  { %v167_v8 = vld [vmem:[#allocation2 + $0x21] sm:$0xff]  ;;  %v146_v9 = vld [vmem:[#allocation2 + $0x9] sm:$0xff]  ;;  %161 = vst.msk [vmem:[#allocation3 + $0x18] sm:$0xff] %vm142_vm5, %v159_v7  ;;  %181 = vst.msk [vmem:[#allocation3 + $0x38] sm:$0xff] %vm142_vm5, %v179_v6 }
  0xb8   :  { %172 = vrot.lane.b32.xlu1 %v167_v8, %s525_s12  ;;  %v158_v10 = vld [vmem:[#allocation2 + $0x2] sm:$0xff]  ;;  %151 = vrot.lane.b32.xlu0 %v146_v9, %s525_s12  ;;  %180 = vst.msk [vmem:[#allocation3 + $0x28] sm:$0xff] %vm142_vm5, %v178_v11 }
  0xb9   :  { %160 = vst.msk [vmem:[#allocation3 + $0x8] sm:$0xff] %vm142_vm5, %v158_v10  ;;  %v163_v12 = vld [vmem:[#allocation2 + $0x20] sm:$0xff]  ;;  %v141_v13 = vld [vmem:[#allocation2 + $0x8] sm:$0xff] }
  0xba   :  { %165 = vst.msk [vmem:[#allocation3 + $0x30] sm:$0xff] %vm142_vm5, %v163_v12  ;;  %144 = vst.msk [vmem:[#allocation3 + $0x10] sm:$0xff] %vm142_vm5, %v141_v13 }
  0xbe   :  { %v185_v20 = vld [vmem:[#allocation3 + $0x18] sm:$0xff] }
  0xbf   :  { %v187_v15 = vld [vmem:[#allocation3 + $0x28] sm:$0xff]  ;;  %v189_v21 = vld [vmem:[#allocation3 + $0x38] sm:$0xff] }
  0xc0   :  { %v183_v14 = vld [vmem:[#allocation3 + $0x8] sm:$0xff]  ;;  %363 = vmatprep.mubr.msk.f32.mxu1 %vm142_vm5, %v187_v15 }
  0xc1   :  { %361 = vmatprep.mubr.msk.f32.mxu0 %vm142_vm5, %v183_v14 }
 0x11d   :  { %v171_v16 = vpop.permute.xlu1 %170  ;;  %v150_v17 = vpop.permute.xlu0 %149 }
 0x11e   :  { %176 = vst.msk [vmem:[#allocation3 + $0x20] sm:$0xff] %vm155_vm6, %v171_v16  ;;  %156 = vst.msk [vmem:[#allocation3] sm:$0xff] %vm155_vm6, %v150_v17 }
 0x125   :  { %v182_v18 = vld [vmem:[#allocation3] sm:$0xff] }
 0x126   :  { %v186_v19 = vld [vmem:[#allocation3 + $0x20] sm:$0xff]  ;;  %298 = vmatmul.mubr.f32.vlgmr.msra.gmra.mrb[0].mxu0 %v182_v18 }
 0x127   :  { %308 = vmatmul.mubr.f32.vlgmr.msra.gmra.mrb[0].mxu1 %v186_v19  ;;  %362 = vmatprep.mubr.msk.f32.mxu0 %vm142_vm5, %v185_v20 }
 0x128   :  { %364 = vmatprep.mubr.msk.f32.mxu1 %vm142_vm5, %v189_v21 }
 0x12a   :  { %v173_v22 = vpop.permute.xlu1 %172  ;;  %v152_v23 = vpop.permute.xlu0 %151 }
 0x12b   :  { %177 = vst.msk [vmem:[#allocation3 + $0x30] sm:$0xff] %vm155_vm6, %v173_v22  ;;  %157 = vst.msk [vmem:[#allocation3 + $0x10] sm:$0xff] %vm155_vm6, %v152_v23 }
 0x132   :  { %v188_v24 = vld [vmem:[#allocation3 + $0x30] sm:$0xff] }
 0x133   :  { %v184_v25 = vld [vmem:[#allocation3 + $0x10] sm:$0xff]  ;;  %313 = vmatmul.mubr.f32.gmra.mrb[2].mxu1 %v188_v24 }
 0x134   :  { %303 = vmatmul.mubr.f32.gmra.mrb[2].mxu0 %v184_v25 }
 0x1f9   :  { %v299_v27 = vpop.f32.mrb[0].mxu0 }
 0x1fa   :  { %v309_v28 = vpop.f32.mrb[0].mxu1  ;;  %v300_v29 = vadd.f32 %v360_v26, %v299_v27  ;;  %v301_v31 = vpop.f32.mrb[1].mxu0 }
 0x1fb   :  { %v310_v30 = vadd.f32 %v360_v26, %v309_v28  ;;  %v311_v32 = vpop.f32.mrb[1].mxu1 }
 0x1fc   :  { %v322_v33 = vmul.f32 0.70710677, %v300_v29  ;;  %v318_v44 = vmul.f32 0.5, %v300_v29 }
 0x1fd   :  { %v324_v34 = vmul.f32 0.70710677, %v310_v30  ;;  %v320_v47 = vmul.f32 0.5, %v310_v30 }
 0x1fe   :  { %436 = verf.f32 %v322_v33 }
 0x1ff   :  { %438 = verf.f32 %v324_v34 }
 0x206   :  { %v314_v35 = vpop.f32.mrb[2].mxu1 }
 0x207   :  { %v304_v36 = vpop.f32.mrb[2].mxu0  ;;  %v315_v37 = vadd.f32 %v360_v26, %v314_v35  ;;  %v316_v38 = vpop.f32.mrb[3].mxu1 }
 0x208   :  { %v305_v39 = vadd.f32 %v360_v26, %v304_v36  ;;  %v306_v40 = vpop.f32.mrb[3].mxu0  ;;  %v437_v41 = vpop.eup %436 }
 0x209   :  { %v325_v42 = vmul.f32 0.70710677, %v315_v37  ;;  %v439_v43 = vpop.eup %438  ;;  %v330_v45 = vadd.f32 1.0, %v437_v41  ;;  %v321_v53 = vmul.f32 0.5, %v315_v37 }
 0x20a   :  { %v323_v46 = vmul.f32 0.70710677, %v305_v39  ;;  %v332_v48 = vadd.f32 1.0, %v439_v43  ;;  %v319_v55 = vmul.f32 0.5, %v305_v39 }
 0x20b   :  { %440 = verf.f32 %v325_v42  ;;  %v334_v49 = vmul.f32 %v330_v45, %v318_v44 }
 0x20c   :  { %442 = verf.f32 %v323_v46  ;;  %v336_v50 = vmul.f32 %v332_v48, %v320_v47 }
 0x20d   :  { %338 = vst [vmem:[#allocation9] sm:$0xff] %v334_v49 }
 0x20e   :  { %340 = vst [vmem:[#allocation9 + $0x10] sm:$0xff] %v336_v50 }
 0x215   :  { %v441_v51 = vpop.eup %440 }
 0x216   :  { %v443_v52 = vpop.eup %442  ;;  %v333_v54 = vadd.f32 1.0, %v441_v51 }
 0x217   :  { %v331_v56 = vadd.f32 1.0, %v443_v52 }
 0x218   :  { %v337_v57 = vmul.f32 %v333_v54, %v321_v53 }
 0x219   :  { %v335_v58 = vmul.f32 %v331_v56, %v319_v55 }
 0x21a   :  { %341 = vst [vmem:[#allocation9 + $0x18] sm:$0xff] %v337_v57 }
 0x21b   :  { %339 = vst [vmem:[#allocation9 + $0x8] sm:$0xff] %v335_v58 }
 0x21c   :  { %499 = shalt.err (!%p496_p6)
}
 0x21d   :  { %s500_s19 = scalar_lea.hbm %s650_s3, 512 }
 0x21e   :  { %p501_p7 = scmp.ne.s32.totalorder %s650_s3, %s500_s19  ;;  %p504_p8 = scmp.lt.u32.totalorder %s500_s19, %s650_s3 }
 0x220   :  { %p506_p9 = pnand %p504_p8, %p501_p7 }
 0x222   :  { %509 = shalt.err (!%p506_p9)
}
 0x223   :  { %353 = dma.vmem_to_hbm [thread:$0]  %s348_s15, 512, %s650_s3, [#allocation6], %s517_s22, %s517_s22, %s518_s23  }
 0x224   :  { %514 = dma.done.wait [#allocation6], 512  }
 0x225   :  { %515 = vsyncadd [#allocation6], 4294966784 }
 0x226   :  { %357 = vsyncpa [#allocation5], 1 }
 0x227   :  { %358 = vsyncpa [#allocation8], 1 }
 0x228   :  { %359 = vsyncpa [#allocation6], 1 }

</bundles_post_ra>
